<compile_context>
chip_gen: v5e
topology: v5e:2x2
jax: 0.10.0
libtpu: 0.0.40
codegen_flags: <defaults>
</compile_context>

<pallas_src>
import jax
import jax.numpy as jnp
from jax import lax
from jax.experimental import pallas as pl
from jax.experimental.pallas import tpu as pltpu


def _fused_kernel(xr_ref, wlt_ref, blt_ref, wct_ref, bcc_ref, o_ref):
    # xr_ref : (K, C*N, H*F)  input values, each repeated F times along lanes
    # wlt_ref: (K, H*F)       Linear weight row k, tiled H times along lanes
    # blt_ref: (1, H*F)       Linear bias, tiled H times along lanes
    # wct_ref: (C, CO, 1)     compact 1x1-conv weights (lane-broadcast in kernel)
    # bcc_ref: (CO, 1)        compact conv bias (lane-broadcast in kernel)
    # o_ref  : (N*CO, H*F)    conv interior + conv bias, one lane-dense slab
    K = xr_ref.shape[0]
    C, CO, _ = wct_ref.shape
    HF = o_ref.shape[1]
    N = xr_ref.shape[1] // C

    # Linear(K -> F) over the last dim: K=3 broadcast multiply-adds on the VPU.
    z = xr_ref[0] * wlt_ref[0:1, :]
    for k in range(1, K):
        z = z + xr_ref[k] * wlt_ref[k:k + 1, :]
    y = 1.0 / (1.0 + jnp.exp(-(z + blt_ref[...])))            # sigmoid, (C*N, H*F)

    # 1x1 conv == channel mix. Lane-broadcast the tiny weights/bias ONCE (hoisted:
    # JAX does not CSE broadcast_in_dim, so do not rebuild these inside the n-loop).
    wcb = [jnp.broadcast_to(wct_ref[c], (CO, HF)) for c in range(C)]   # C x (CO, H*F)
    bcb = jnp.broadcast_to(bcc_ref[...], (CO, HF))                     # (CO, H*F)

    rows = []
    for n in range(N):
        acc = bcb + wcb[0] * y[0 * N + n:0 * N + n + 1, :]
        for c in range(1, C):
            acc = acc + wcb[c] * y[c * N + n:c * N + n + 1, :]
        rows.append(acc)
    o_ref[...] = jnp.concatenate(rows, axis=0)                # one full (N*CO, H*F) store


def prepare_params(wlin, blin, wconv, bconv, N, C, H):
    """One-time (init) relayout of the weights; pure function of the parameters."""
    F = wlin.shape[0]            # Linear out_features
    CO = wconv.shape[0]          # conv out_channels
    HF = H * F
    # wlt[k, h*F + f] = wlin[f, k]
    wlt = jnp.tile(jnp.transpose(wlin), (1, H))                         # (K, H*F)
    # blt[0, h*F + f] = blin[f]
    blt = jnp.tile(blin, (H,)).reshape(1, HF)                           # (1, H*F)
    # wct[c, o, 0] = wconv[o, c, 0, 0]   (compact, 96 B)
    wct = jnp.transpose(wconv.reshape(CO, C)).reshape(C, CO, 1)         # (C, CO, 1)
    # bcc[o, 0] = bconv[o]               (compact, 32 B)
    bcc = bconv.reshape(CO, 1)                                          # (CO, 1)
    # Bias-filled padded slab: border of a padding=1, 1x1 conv is exactly the bias.
    bias_full = jnp.broadcast_to(bconv.reshape(1, CO, 1, 1),
                                 (N, CO, H + 2, F + 2)).astype(jnp.float32)
    return wlt, blt, wct, bcc, bias_full


@jax.jit
def model_forward(x, wlt, blt, wct, bcc, bias_full):
    """x: (N, C, H, K) f32 NCHW; returns (N, CO, H+2, F+2) matching the PyTorch module."""
    N, C, H, K = x.shape
    HF = wlt.shape[1]
    F = HF // H
    CO = wct.shape[1]

    # Single fused relayout of x (transpose + lane expansion in one XLA fusion):
    # xr[k, c*N + n, h*F + f] = x[n, c, h, k]
    xr = jnp.transpose(x, (3, 1, 0, 2))                                 # (K, C, N, H)
    xr = jnp.broadcast_to(xr[..., None], (K, C, N, H, F)).reshape(K, C * N, HF)

    interior = pl.pallas_call(
        _fused_kernel,
        out_shape=jax.ShapeDtypeStruct((N * CO, HF), jnp.float32),
        grid_spec=pltpu.PrefetchScalarGridSpec(
            num_scalar_prefetch=0,
            grid=(1,),
            in_specs=[
                pl.BlockSpec((K, C * N, HF), lambda i: (0, 0, 0)),
                pl.BlockSpec((K, HF), lambda i: (0, 0)),
                pl.BlockSpec((1, HF), lambda i: (0, 0)),
                pl.BlockSpec((C, CO, 1), lambda i: (0, 0, 0)),
                pl.BlockSpec((CO, 1), lambda i: (0, 0)),
            ],
            out_specs=pl.BlockSpec((N * CO, HF), lambda i: (0, 0)),
        ),
        compiler_params=pltpu.CompilerParams(dimension_semantics=("arbitrary",)),
    )(xr, wlt, blt, wct, bcc)

    # Interior already carries the conv bias; the border is bias-only -> single
    # dynamic_update_slice into the precomputed bias slab (reshape is a bitcast).
    interior = interior.reshape(N, CO, H, F)
    return lax.dynamic_update_slice(bias_full, interior, (0, 0, 1, 1))


def reference(x, wlin, blin, wconv, bconv):
    """Pure-JAX reference reproducing the PyTorch forward."""
    hi = jax.lax.Precision.HIGHEST
    y = jnp.einsum("nchk,fk->nchf", x, wlin, precision=hi) + blin       # Linear on last dim
    y = 1.0 / (1.0 + jnp.exp(-y))                                       # sigmoid
    yp = jnp.pad(y, ((0, 0), (0, 0), (1, 1), (1, 1)))                   # Conv2d padding=1
    wc = wconv.reshape(wconv.shape[0], wconv.shape[1])
    out = jnp.einsum("oc,nchw->nohw", wc, yp, precision=hi) + bconv.reshape(1, -1, 1, 1)
    return out


if __name__ == "__main__":
    key = jax.random.PRNGKey(0)
    kx, kw1, kb1, kw2, kb2 = jax.random.split(key, 5)

    N, C, H, W = 2, 3, 16, 3       # NCHW; W = 3 so Linear(3, 8) is valid on the last dim
    F_out, CO = 8, 8

    x = jax.random.normal(kx, (N, C, H, W), dtype=jnp.float32)

    lim1 = 1.0 / (W ** 0.5)        # nn.Linear default init range
    wlin = jax.random.uniform(kw1, (F_out, W), jnp.float32, -lim1, lim1)
    blin = jax.random.uniform(kb1, (F_out,), jnp.float32, -lim1, lim1)

    lim2 = 1.0 / (C ** 0.5)        # nn.Conv2d default init range (fan_in = C*1*1)
    wconv = jax.random.uniform(kw2, (CO, C, 1, 1), jnp.float32, -lim2, lim2)
    bconv = jax.random.uniform(kb2, (CO,), jnp.float32, -lim2, lim2)

    # One-time weight relayout (init), not part of the per-call path.
    params = prepare_params(wlin, blin, wconv, bconv, N, C, H)
    params = jax.tree_util.tree_map(jax.block_until_ready, params)

    out = model_forward(x, *params)
    out = jax.block_until_ready(out)

    ref = reference(x, wlin, blin, wconv, bconv)
    assert out.shape == (N, CO, H + 2, F_out + 2), out.shape
    assert out.dtype == jnp.float32
    assert jnp.allclose(out, ref, atol=1e-5, rtol=1e-5), float(jnp.max(jnp.abs(out - ref)))

    print("KERNEL_OK")
</pallas_src>

<mosaic_0001>
module attributes {stable_mosaic.version = 11 : i64} {
  func.func @_fused_kernel(%arg0: i32, %arg1: memref<3x6x128xf32, #tpu.memory_space<vmem>>, %arg2: memref<3x128xf32, #tpu.memory_space<vmem>>, %arg3: memref<1x128xf32, #tpu.memory_space<vmem>>, %arg4: memref<3x8x1xf32, #tpu.memory_space<vmem>>, %arg5: memref<8x1xf32, #tpu.memory_space<vmem>>, %arg6: memref<16x128xf32, #tpu.memory_space<vmem>>) attributes {dimension_semantics = [#tpu.dimension_semantics<arbitrary>], iteration_bounds = array<i64: 1>, scalar_prefetch = 0 : i64, scratch_operands = 0 : i64, tpu.core_type = #tpu.core_type<tc>, window_params = [{pipeline_mode = #tpu.pipeline_mode<synchronous>, transform_indices = @transform_0, window_bounds = array<i64: 3, 6, 128>}, {pipeline_mode = #tpu.pipeline_mode<synchronous>, transform_indices = @transform_1, window_bounds = array<i64: 3, 128>}, {pipeline_mode = #tpu.pipeline_mode<synchronous>, transform_indices = @transform_2, window_bounds = array<i64: 1, 128>}, {pipeline_mode = #tpu.pipeline_mode<synchronous>, transform_indices = @transform_3, window_bounds = array<i64: 3, 8, 1>}, {pipeline_mode = #tpu.pipeline_mode<synchronous>, transform_indices = @transform_4, window_bounds = array<i64: 8, 1>}, {pipeline_mode = #tpu.pipeline_mode<synchronous>, transform_indices = @transform_5, window_bounds = array<i64: 16, 128>}]} {
    %c0 = arith.constant 0 : index
    %c0_0 = arith.constant 0 : index
    %c0_1 = arith.constant 0 : index
    %0 = vector.load %arg1[%c0, %c0_0, %c0_1] : memref<3x6x128xf32, #tpu.memory_space<vmem>>, vector<1x6x128xf32>
    %1 = vector.shape_cast %0 : vector<1x6x128xf32> to vector<6x128xf32>
    %c0_2 = arith.constant 0 : index
    %c0_3 = arith.constant 0 : index
    %2 = vector.load %arg2[%c0_2, %c0_3] : memref<3x128xf32, #tpu.memory_space<vmem>>, vector<1x128xf32>
    %3 = vector.broadcast %2 : vector<1x128xf32> to vector<6x128xf32>
    %4 = arith.mulf %1, %3 : vector<6x128xf32>
    %c1 = arith.constant 1 : index
    %c0_4 = arith.constant 0 : index
    %c0_5 = arith.constant 0 : index
    %5 = vector.load %arg1[%c1, %c0_4, %c0_5] : memref<3x6x128xf32, #tpu.memory_space<vmem>>, vector<1x6x128xf32>
    %6 = vector.shape_cast %5 : vector<1x6x128xf32> to vector<6x128xf32>
    %c1_6 = arith.constant 1 : index
    %c0_7 = arith.constant 0 : index
    %7 = vector.load %arg2[%c1_6, %c0_7] : memref<3x128xf32, #tpu.memory_space<vmem>>, vector<1x128xf32>
    %8 = vector.broadcast %7 : vector<1x128xf32> to vector<6x128xf32>
    %9 = arith.mulf %6, %8 : vector<6x128xf32>
    %10 = arith.addf %4, %9 : vector<6x128xf32>
    %c2 = arith.constant 2 : index
    %c0_8 = arith.constant 0 : index
    %c0_9 = arith.constant 0 : index
    %11 = vector.load %arg1[%c2, %c0_8, %c0_9] : memref<3x6x128xf32, #tpu.memory_space<vmem>>, vector<1x6x128xf32>
    %12 = vector.shape_cast %11 : vector<1x6x128xf32> to vector<6x128xf32>
    %c2_10 = arith.constant 2 : index
    %c0_11 = arith.constant 0 : index
    %13 = vector.load %arg2[%c2_10, %c0_11] : memref<3x128xf32, #tpu.memory_space<vmem>>, vector<1x128xf32>
    %14 = vector.broadcast %13 : vector<1x128xf32> to vector<6x128xf32>
    %15 = arith.mulf %12, %14 : vector<6x128xf32>
    %16 = arith.addf %10, %15 : vector<6x128xf32>
    %c0_12 = arith.constant 0 : index
    %c0_13 = arith.constant 0 : index
    %17 = vector.load %arg3[%c0_12, %c0_13] : memref<1x128xf32, #tpu.memory_space<vmem>>, vector<1x128xf32>
    %18 = vector.broadcast %17 : vector<1x128xf32> to vector<6x128xf32>
    %19 = arith.addf %16, %18 : vector<6x128xf32>
    %cst = arith.constant 0.000000e+00 : f32
    %20 = vector.broadcast %cst : f32 to vector<6x128xf32>
    %21 = arith.subf %20, %19 : vector<6x128xf32>
    %22 = math.exp %21 : vector<6x128xf32>
    %cst_14 = arith.constant 1.000000e+00 : f32
    %23 = vector.broadcast %cst_14 : f32 to vector<6x128xf32>
    %24 = arith.addf %23, %22 : vector<6x128xf32>
    %cst_15 = arith.constant 1.000000e+00 : f32
    %25 = vector.broadcast %cst_15 : f32 to vector<6x128xf32>
    %26 = arith.divf %25, %24 : vector<6x128xf32>
    %c0_16 = arith.constant 0 : index
    %c0_17 = arith.constant 0 : index
    %c0_18 = arith.constant 0 : index
    %27 = vector.load %arg4[%c0_16, %c0_17, %c0_18] : memref<3x8x1xf32, #tpu.memory_space<vmem>>, vector<1x8x1xf32>
    %28 = vector.shape_cast %27 : vector<1x8x1xf32> to vector<8x1xf32>
    %29 = vector.shape_cast %28 : vector<8x1xf32> to vector<8x1xf32>
    %30 = vector.broadcast %29 : vector<8x1xf32> to vector<8x128xf32>
    %c1_19 = arith.constant 1 : index
    %c0_20 = arith.constant 0 : index
    %c0_21 = arith.constant 0 : index
    %31 = vector.load %arg4[%c1_19, %c0_20, %c0_21] : memref<3x8x1xf32, #tpu.memory_space<vmem>>, vector<1x8x1xf32>
    %32 = vector.shape_cast %31 : vector<1x8x1xf32> to vector<8x1xf32>
    %33 = vector.shape_cast %32 : vector<8x1xf32> to vector<8x1xf32>
    %34 = vector.broadcast %33 : vector<8x1xf32> to vector<8x128xf32>
    %c2_22 = arith.constant 2 : index
    %c0_23 = arith.constant 0 : index
    %c0_24 = arith.constant 0 : index
    %35 = vector.load %arg4[%c2_22, %c0_23, %c0_24] : memref<3x8x1xf32, #tpu.memory_space<vmem>>, vector<1x8x1xf32>
    %36 = vector.shape_cast %35 : vector<1x8x1xf32> to vector<8x1xf32>
    %37 = vector.shape_cast %36 : vector<8x1xf32> to vector<8x1xf32>
    %38 = vector.broadcast %37 : vector<8x1xf32> to vector<8x128xf32>
    %c0_25 = arith.constant 0 : index
    %c0_26 = arith.constant 0 : index
    %39 = vector.load %arg5[%c0_25, %c0_26] : memref<8x1xf32, #tpu.memory_space<vmem>>, vector<8x1xf32>
    %40 = vector.shape_cast %39 : vector<8x1xf32> to vector<8x1xf32>
    %41 = vector.broadcast %40 : vector<8x1xf32> to vector<8x128xf32>
    %42 = vector.extract_strided_slice %26 {offsets = [0, 0], sizes = [1, 128], strides = [1, 1]} : vector<6x128xf32> to vector<1x128xf32>
    %43 = vector.broadcast %42 : vector<1x128xf32> to vector<8x128xf32>
    %44 = arith.mulf %30, %43 : vector<8x128xf32>
    %45 = arith.addf %41, %44 : vector<8x128xf32>
    %46 = vector.extract_strided_slice %26 {offsets = [2, 0], sizes = [1, 128], strides = [1, 1]} : vector<6x128xf32> to vector<1x128xf32>
    %47 = vector.broadcast %46 : vector<1x128xf32> to vector<8x128xf32>
    %48 = arith.mulf %34, %47 : vector<8x128xf32>
    %49 = arith.addf %45, %48 : vector<8x128xf32>
    %50 = vector.extract_strided_slice %26 {offsets = [4, 0], sizes = [1, 128], strides = [1, 1]} : vector<6x128xf32> to vector<1x128xf32>
    %51 = vector.broadcast %50 : vector<1x128xf32> to vector<8x128xf32>
    %52 = arith.mulf %38, %51 : vector<8x128xf32>
    %53 = arith.addf %49, %52 : vector<8x128xf32>
    %54 = vector.extract_strided_slice %26 {offsets = [1, 0], sizes = [1, 128], strides = [1, 1]} : vector<6x128xf32> to vector<1x128xf32>
    %55 = vector.broadcast %54 : vector<1x128xf32> to vector<8x128xf32>
    %56 = arith.mulf %30, %55 : vector<8x128xf32>
    %57 = arith.addf %41, %56 : vector<8x128xf32>
    %58 = vector.extract_strided_slice %26 {offsets = [3, 0], sizes = [1, 128], strides = [1, 1]} : vector<6x128xf32> to vector<1x128xf32>
    %59 = vector.broadcast %58 : vector<1x128xf32> to vector<8x128xf32>
    %60 = arith.mulf %34, %59 : vector<8x128xf32>
    %61 = arith.addf %57, %60 : vector<8x128xf32>
    %62 = vector.extract_strided_slice %26 {offsets = [5, 0], sizes = [1, 128], strides = [1, 1]} : vector<6x128xf32> to vector<1x128xf32>
    %63 = vector.broadcast %62 : vector<1x128xf32> to vector<8x128xf32>
    %64 = arith.mulf %38, %63 : vector<8x128xf32>
    %65 = arith.addf %61, %64 : vector<8x128xf32>
    %66 = tpu.concatenate %53, %65 in 0 : vector<8x128xf32>, vector<8x128xf32> -> vector<16x128xf32>
    %c0_27 = arith.constant 0 : index
    %c0_28 = arith.constant 0 : index
    %67 = vector.load %arg6[%c0_27, %c0_28] : memref<16x128xf32, #tpu.memory_space<vmem>>, vector<16x128xf32>
    tpu.vector_store %arg6[%c0_27, %c0_28], %66 {strides = array<i32>} : memref<16x128xf32, #tpu.memory_space<vmem>>, vector<16x128xf32>,
    return
  }
  func.func @transform_0(%arg0: i32) -> (i32, i32, i32) {
    %c0_i32 = arith.constant 0 : i32
    %c0_i32_0 = arith.constant 0 : i32
    %c0_i32_1 = arith.constant 0 : i32
    %c0_i32_2 = arith.constant 0 : i32
    return %c0_i32, %c0_i32_0, %c0_i32_1 : i32, i32, i32
  }
  func.func @transform_1(%arg0: i32) -> (i32, i32) {
    %c0_i32 = arith.constant 0 : i32
    %c0_i32_0 = arith.constant 0 : i32
    %c0_i32_1 = arith.constant 0 : i32
    return %c0_i32, %c0_i32_0 : i32, i32
  }
  func.func @transform_2(%arg0: i32) -> (i32, i32) {
    %c0_i32 = arith.constant 0 : i32
    %c0_i32_0 = arith.constant 0 : i32
    %c0_i32_1 = arith.constant 0 : i32
    return %c0_i32, %c0_i32_0 : i32, i32
  }
  func.func @transform_3(%arg0: i32) -> (i32, i32, i32) {
    %c0_i32 = arith.constant 0 : i32
    %c0_i32_0 = arith.constant 0 : i32
    %c0_i32_1 = arith.constant 0 : i32
    %c0_i32_2 = arith.constant 0 : i32
    return %c0_i32, %c0_i32_0, %c0_i32_1 : i32, i32, i32
  }
  func.func @transform_4(%arg0: i32) -> (i32, i32) {
    %c0_i32 = arith.constant 0 : i32
    %c0_i32_0 = arith.constant 0 : i32
    %c0_i32_1 = arith.constant 0 : i32
    return %c0_i32, %c0_i32_0 : i32, i32
  }
  func.func @transform_5(%arg0: i32) -> (i32, i32) {
    %c0_i32 = arith.constant 0 : i32
    %c0_i32_0 = arith.constant 0 : i32
    %c0_i32_1 = arith.constant 0 : i32
    return %c0_i32, %c0_i32_0 : i32, i32
  }
}

</mosaic_0001>

<bundles_post_ra>
// kernel: model_forward.1
= control target key start
LH: loop header
LB: loop body
LE: loop exit
PB: predicated region body
PF: predicated region fallthrough
CT: control target
= control target key end

     0   :  { %v125_v0 = vmov 0   ;;  %s195_s4 = inlined_call_operand.vmem [shape: f32[8,1], index: 4, kind: input, shape index: {}]   ;;  %s196_s3 = inlined_call_operand.vmem [shape: f32[3,8,1], index: 3, kind: input, shape index: {}]   ;;  %s197_s1 = inlined_call_operand.vmem [shape: f32[3,128], index: 1, kind: input, shape index: {}]   ;;  %s198_s2 = inlined_call_operand.vmem [shape: f32[1,128], index: 2, kind: input, shape index: {}]   ;;  %s199_s0 = inlined_call_operand.vmem [shape: f32[3,6,128], index: 0, kind: input, shape index: {}]   ;;  %s200_s5 = inlined_call_operand.vmem [shape: f32[16,128], index: 5, kind: output, shape index: {}]  }
   0x1   :  { %116 = vset.pattern.permute.xlu1 %v125_v0  ;;  %115 = vset.pattern.permute.xlu0 %v125_v0  ;;  %v80_v1 = vld [vmem:[%s195_s4] sm:$0xff]  ;;  %v113_v3 = vld [vmem:[%s196_s3 + $0x10] sm:$0xff]  ;;  %v112_v4 = vld [vmem:[%s196_s3 + $0x8] sm:$0xff] }
   0x2   :  { %v60_v2 = vld [vmem:[%s196_s3] sm:$0xff]  ;;  %83 = vperm.xlu1 %116, %v80_v1   ;;  %v110_v8 = vld [vmem:[%s199_s0 + $0x8] sm:$0x3f]  ;;  %v111_v12 = vld [vmem:[%s199_s0 + $0x10] sm:$0x3f] }
   0x3   :  { %63 = vperm.xlu0 %115, %v60_v2   ;;  %v117_v5 = vld [vmem:[%s197_s1] ss:$0 sm:$0xff]  ;;  %v118_v6 = vld [vmem:[%s197_s1 + $0x1] ss:$0 sm:$0xff]  ;;  %v119_v11 = vld [vmem:[%s197_s1 + $0x2] ss:$0 sm:$0xff] }
   0x4   :  { %v20_v7 = vld [vmem:[%s199_s0] sm:$0x3f]  ;;  %v28_v10 = vmul.f32 %v118_v6, %v110_v8  ;;  %v34_v14 = vmul.f32 %v119_v11, %v111_v12 }
   0x5   :  { %v23_v9 = vmul.f32 %v117_v5, %v20_v7  ;;  %v120_v16 = vld [vmem:[%s198_s2] ss:$0 sm:$0xff] }
   0x7   :  { %v29_v13 = vadd.f32 %v28_v10, %v23_v9 }
   0x9   :  { %v35_v15 = vadd.f32 %v34_v14, %v29_v13 }
   0xa   :  { %77 = vperm.xlu1 %116, %v113_v3  }
   0xb   :  { %70 = vperm.xlu0 %115, %v112_v4   ;;  %v40_v17 = vadd.f32 %v120_v16, %v35_v15 }
   0xd   :  { %v41_v18 = vsub.f32 0.0, %v40_v17 }
   0xf   :  { %v42_v19 = vmul.f32 1.442695, %v41_v18 }
  0x11   :  { %121 = vpow2.f32 %v42_v19 }
  0x17   :  { %v122_v20 = vpop.eup %121 }
  0x18   :  { %v44_v21 = vadd.f32 1.0, %v122_v20 }
  0x1a   :  { %123 = vrcp.f32 %v44_v21  ;;  %vm50_vm0 = vweird.f32 %v44_v21  ;;  %v56_v26 = vand.u32 2147483648, %v44_v21  ;;  %v54_v28 = vand.u32 2147483647, %v44_v21 }
  0x1c   :  { %v57_v29 = vor.u32 1.1754944e-38, %v56_v26  ;;  %vm55_vm3 = vcmp.eq.f32.partialorder %v54_v28, 8.507059e+37 }
  0x20   :  { %v124_v22 = vpop.eup %123 }
  0x21   :  { %v46_v23 = vmul.f32 %v124_v22, %v44_v21  ;;  %vm51_vm1 = vweird.f32 %v124_v22 }
  0x22   :  { %vm52_vm2 = vmor %vm50_vm0, %vm51_vm1 }
  0x23   :  { %v47_v24 = vsub.f32 1.0, %v46_v23 }
  0x25   :  { %v48_v25 = vmul.f32 %v124_v22, %v47_v24 }
  0x27   :  { %v49_v27 = vadd.f32 %v124_v22, %v48_v25 }
  0x29   :  { %v53_v30 = vsel %vm52_vm2, %v124_v22, %v49_v27 }
  0x2a   :  { %v58_v31 = vsel %vm55_vm3, %v57_v29, %v53_v30 }
  0x2b   :  { %v86_v34 = vperm.slane %v58_v31, 0  ;;  %v95_v35 = vperm.slane %v58_v31, 1  ;;  %v89_v38 = vperm.slane %v58_v31, 2  ;;  %v98_v39 = vperm.slane %v58_v31, 3 }
  0x2c   :  { %v92_v40 = vperm.slane %v58_v31, 4  ;;  %v101_v41 = vperm.slane %v58_v31, 5 }
  0x74   :  { %v84_v32 = vpop.permute.xlu1 %83 }
  0x75   :  { %v64_v33 = vpop.permute.xlu0 %63 }
  0x76   :  { %v87_v36 = vmul.f32 %v86_v34, %v64_v33  ;;  %v96_v37 = vmul.f32 %v95_v35, %v64_v33 }
  0x78   :  { %v88_v44 = vadd.f32 %v87_v36, %v84_v32  ;;  %v97_v45 = vadd.f32 %v96_v37, %v84_v32 }
  0x7c   :  { %v78_v42 = vpop.permute.xlu1 %77 }
  0x7d   :  { %v71_v43 = vpop.permute.xlu0 %70  ;;  %v93_v48 = vmul.f32 %v92_v40, %v78_v42  ;;  %v102_v49 = vmul.f32 %v101_v41, %v78_v42 }
  0x7e   :  { %v90_v46 = vmul.f32 %v89_v38, %v71_v43  ;;  %v99_v47 = vmul.f32 %v98_v39, %v71_v43 }
  0x80   :  { %v91_v50 = vadd.f32 %v90_v46, %v88_v44  ;;  %v100_v51 = vadd.f32 %v99_v47, %v97_v45 }
  0x82   :  { %v94_v52 = vadd.f32 %v93_v48, %v91_v50  ;;  %v103_v53 = vadd.f32 %v102_v49, %v100_v51 }
  0x84   :  { %104 = vst [vmem:[%s200_s5] sm:$0xff] %v94_v52 }
  0x85   :  { %105 = vst [vmem:[%s200_s5 + $0x8] sm:$0xff] %v103_v53 }

</bundles_post_ra>
